<compile_context>
chip_gen: v6e
topology: v6e:2x2x1
jax: 0.10.0
libtpu: 0.0.40
codegen_flags: <defaults>
</compile_context>

<pallas_src>
import functools

import jax
import jax.numpy as jnp
from jax.experimental import pallas as pl
from jax.experimental.pallas import tpu as pltpu


def _subtree_merger_kernel(ne_ref, s1_ref, s2_ref,
                           w_ne_ref, w_s1_ref, w_s2_ref, b_ref,
                           out_ref):
    """Fused dual-Linear + tanh/sigmoid gate, one batch tile per grid step.

    ne_ref  : (tB, E)      node_embedding tile   (storage dtype, f32 or bf16)
    s1_ref  : (tB, H)      sub_tree_1 tile
    s2_ref  : (tB, H)      sub_tree_2 tile
    w_ne_ref: (E, 2H)      fused weight rows for node_embedding
    w_s1_ref: (H, 2H)      fused weight rows for sub_tree_1
    w_s2_ref: (H, 2H)      fused weight rows for sub_tree_2
    b_ref   : (1, 2H)      fused bias  [b_merge | b_merge_g]   (f32)
    out_ref : (tB, H)
    """
    # Split-K fused matmul, equivalent to cat(ne, s1, s2) @ [Wm^T | Wg^T].
    # No in-kernel dtype casts: operands stay in their HBM storage dtype
    # (bf16 end-to-end halves DMA bytes); accumulation is always f32.
    h = jnp.dot(ne_ref[...], w_ne_ref[...], preferred_element_type=jnp.float32)
    h = h + jnp.dot(s1_ref[...], w_s1_ref[...], preferred_element_type=jnp.float32)
    h = h + jnp.dot(s2_ref[...], w_s2_ref[...], preferred_element_type=jnp.float32)
    h = h + b_ref[...]                      # broadcast (1, 2H) -> (tB, 2H), f32

    H = out_ref.shape[-1]
    # NOTE: for 2H <= 128 both halves share a vreg; the split is XLU selects
    # (free — XLU slot is otherwise idle in this epilogue).
    sub_tree = jnp.tanh(h[:, :H])           # merge branch   (EUP)
    gate = jax.nn.sigmoid(h[:, H:])         # merge_g branch (EUP)
    out_ref[...] = (sub_tree * gate).astype(out_ref.dtype)


def prepare_subtree_merger_params(w_merge, b_merge, w_merge_g, b_merge_g,
                                  embedding_size, compute_dtype=jnp.float32):
    """One-time parameter prep ("model init") — keeps the per-call path clean.

    w_merge / w_merge_g : (H, D) PyTorch nn.Linear weight layout, D = E + 2H
    b_merge / b_merge_g : (H,)
    Returns pre-transposed, pre-fused, pre-split weights:
      w_ne (E, 2H), w_s1 (H, 2H), w_s2 (H, 2H)  in `compute_dtype`
      b_fused (1, 2H)                           in f32 (elementwise path dtype)
    `compute_dtype` should match the activations' HBM storage dtype.
    """
    H = w_merge.shape[0]
    E = embedding_size
    # Fused weight: columns [:H] -> merge, [H:] -> merge_g.
    w_fused = jnp.concatenate(
        [jnp.transpose(w_merge), jnp.transpose(w_merge_g)], axis=1
    ).astype(compute_dtype)                                   # (D, 2H)
    w_ne = w_fused[:E]                                        # (E, 2H)
    w_s1 = w_fused[E:E + H]                                   # (H, 2H)
    w_s2 = w_fused[E + H:]                                    # (H, 2H)
    b_fused = jnp.concatenate([b_merge, b_merge_g]).reshape(1, 2 * H)
    b_fused = b_fused.astype(jnp.float32)
    return w_ne, w_s1, w_s2, b_fused


def _round_up(x, m):
    return ((x + m - 1) // m) * m


@functools.partial(jax.jit,
                   static_argnames=("block_rows", "num_cores",
                                    "vmem_budget_bytes"))
def subtree_merger_forward(node_embedding, sub_tree_1, sub_tree_2, params,
                           block_rows=8192, num_cores=1,
                           vmem_budget_bytes=36 * 1024 * 1024):
    """Forward pass. `params` comes from prepare_subtree_merger_params().

    node_embedding : (B, E)
    sub_tree_1/2   : (B, H)
    num_cores      : pass 2 on v7x so the grid has >= 2 parallel steps.
    returns        : (B, H)  in the activations' dtype
    """
    # TODO(synk): em_dropout omitted (eval-mode identity); training-mode dropout
    # would need pltpu.prng_seed / pltpu.prng_random_bits masking in-kernel.
    w_ne, w_s1, w_s2, b_fused = params
    B, E = node_embedding.shape
    H = sub_tree_1.shape[1]
    H2 = 2 * H
    D = E + 2 * H

    act_bytes = jnp.dtype(node_embedding.dtype).itemsize
    w_bytes = jnp.dtype(w_ne.dtype).itemsize

    # ---- VMEM-aware batch-tile sizing ---------------------------------------
    # Double-buffered activation/output tiles + (double-buffered) weights/bias.
    weight_vmem = 2 * ((D * H2) * w_bytes + H2 * 4)
    per_row_vmem = 2 * act_bytes * (E + H + H + H)        # ne + s1 + s2 + out
    rows_fit = max(8, (vmem_budget_bytes - weight_vmem) // per_row_vmem)
    tB = min(block_rows, int(rows_fit))
    if num_cores > 1:
        # Ensure >= num_cores grid steps so "parallel" shards across TCs.
        tB = min(tB, _round_up(pl.cdiv(B, num_cores), 8))
    if tB >= B:
        tB = B                      # single full-array tile: grid=(1,)
    else:
        tB = max(8, (tB // 8) * 8)  # sublane-aligned tile
    grid = (pl.cdiv(B, tB),)
    # NOTE: when B % tB != 0 the last tile computes tanh/sigmoid on padded rows;
    # the OOB rows of the output block are discarded, so this is harmless.

    cost = pl.CostEstimate(
        flops=2 * B * D * H2,                               # fused dual matmul
        transcendentals=2 * B * H,                          # tanh + sigmoid
        bytes_accessed=(B * (D + H) * act_bytes            # activations + out
                        + D * H2 * w_bytes + H2 * 4),       # weights + bias
    )

    return pl.pallas_call(
        _subtree_merger_kernel,
        out_shape=jax.ShapeDtypeStruct((B, H), node_embedding.dtype),
        grid=grid,
        in_specs=[
            pl.BlockSpec((tB, E), lambda i: (i, 0)),    # node_embedding tile
            pl.BlockSpec((tB, H), lambda i: (i, 0)),    # sub_tree_1 tile
            pl.BlockSpec((tB, H), lambda i: (i, 0)),    # sub_tree_2 tile
            pl.BlockSpec((E, H2), lambda i: (0, 0)),    # weights: VMEM-resident,
            pl.BlockSpec((H, H2), lambda i: (0, 0)),    # same block every step
            pl.BlockSpec((H, H2), lambda i: (0, 0)),
            pl.BlockSpec((1, H2), lambda i: (0, 0)),    # fused bias (f32)
        ],
        out_specs=pl.BlockSpec((tB, H), lambda i: (i, 0)),
        compiler_params=pltpu.CompilerParams(
            dimension_semantics=("parallel",),          # megacore-shard B
            vmem_limit_bytes=48 * 1024 * 1024,          # v7x-safe (64 MiB phys)
        ),
        cost_estimate=cost,
    )(node_embedding, sub_tree_1, sub_tree_2, w_ne, w_s1, w_s2, b_fused)


def _reference(node_embedding, sub_tree_1, sub_tree_2,
               w_merge, b_merge, w_merge_g, b_merge_g):
    x = jnp.concatenate([node_embedding, sub_tree_1, sub_tree_2], axis=1)
    s = jnp.tanh(x @ w_merge.T + b_merge)
    g = jax.nn.sigmoid(x @ w_merge_g.T + b_merge_g)
    return s * g


if __name__ == "__main__":
    # Small shapes consistent with the module's forward.
    B = 16
    hidden_size = 32
    embedding_size = 32
    D = hidden_size * 2 + embedding_size  # 96

    key = jax.random.PRNGKey(0)
    k1, k2, k3, k4, k5, k6, k7 = jax.random.split(key, 7)

    node_embedding = jax.random.normal(k1, (B, embedding_size), dtype=jnp.float32)
    sub_tree_1 = jax.random.normal(k2, (B, hidden_size), dtype=jnp.float32)
    sub_tree_2 = jax.random.normal(k3, (B, hidden_size), dtype=jnp.float32)

    # Deterministic params (nn.Linear layout: weight (out, in), bias (out,)).
    bound = 1.0 / jnp.sqrt(D)
    w_merge = jax.random.uniform(k4, (hidden_size, D), minval=-bound, maxval=bound)
    b_merge = jax.random.uniform(k5, (hidden_size,), minval=-bound, maxval=bound)
    w_merge_g = jax.random.uniform(k6, (hidden_size, D), minval=-bound, maxval=bound)
    b_merge_g = jax.random.uniform(k7, (hidden_size,), minval=-bound, maxval=bound)

    ref = _reference(node_embedding, sub_tree_1, sub_tree_2,
                     w_merge, b_merge, w_merge_g, b_merge_g)

    # --- f32 end-to-end, single full-batch tile (grid=(1,)): exact parity -----
    params_f32 = prepare_subtree_merger_params(
        w_merge, b_merge, w_merge_g, b_merge_g, embedding_size,
        compute_dtype=jnp.float32)
    out_f32 = jax.block_until_ready(
        subtree_merger_forward(node_embedding, sub_tree_1, sub_tree_2,
                               params_f32))
    assert out_f32.shape == (B, hidden_size)
    assert jnp.allclose(out_f32, ref, atol=1e-5, rtol=1e-5)

    # --- multi-step grid path (exercises tiling / megacore-style split) -------
    out_tiled = jax.block_until_ready(
        subtree_merger_forward(node_embedding, sub_tree_1, sub_tree_2,
                               params_f32, num_cores=2))      # grid=(2,)
    assert jnp.allclose(out_tiled, ref, atol=1e-5, rtol=1e-5)

    # --- bf16 end-to-end HBM residency (halves streamed bytes), f32 compute ---
    ne_bf16 = node_embedding.astype(jnp.bfloat16)
    s1_bf16 = sub_tree_1.astype(jnp.bfloat16)
    s2_bf16 = sub_tree_2.astype(jnp.bfloat16)
    params_bf16 = prepare_subtree_merger_params(
        w_merge, b_merge, w_merge_g, b_merge_g, embedding_size,
        compute_dtype=jnp.bfloat16)
    out_bf16 = jax.block_until_ready(
        subtree_merger_forward(ne_bf16, s1_bf16, s2_bf16, params_bf16))
    assert out_bf16.shape == (B, hidden_size)
    assert out_bf16.dtype == jnp.bfloat16
    assert jnp.allclose(out_bf16.astype(jnp.float32), ref, atol=5e-2, rtol=5e-2)

    print("KERNEL_OK")
</pallas_src>

<mosaic_0001>
module attributes {stable_mosaic.version = 11 : i64} {
  func.func @_subtree_merger_kernel(%arg0: i32, %arg1: memref<16x32xf32, #tpu.memory_space<vmem>>, %arg2: memref<16x32xf32, #tpu.memory_space<vmem>>, %arg3: memref<16x32xf32, #tpu.memory_space<vmem>>, %arg4: memref<32x64xf32, #tpu.memory_space<vmem>>, %arg5: memref<32x64xf32, #tpu.memory_space<vmem>>, %arg6: memref<32x64xf32, #tpu.memory_space<vmem>>, %arg7: memref<1x64xf32, #tpu.memory_space<vmem>>, %arg8: memref<16x32xf32, #tpu.memory_space<vmem>>) attributes {dimension_semantics = [#tpu.dimension_semantics<parallel>], iteration_bounds = array<i64: 1>, scalar_prefetch = 0 : i64, scratch_operands = 0 : i64, tpu.core_type = #tpu.core_type<tc>, window_params = [{transform_indices = @transform_0, window_bounds = array<i64: 16, 32>}, {transform_indices = @transform_1, window_bounds = array<i64: 16, 32>}, {transform_indices = @transform_2, window_bounds = array<i64: 16, 32>}, {pipeline_mode = #tpu.pipeline_mode<synchronous>, transform_indices = @transform_3, window_bounds = array<i64: 32, 64>}, {pipeline_mode = #tpu.pipeline_mode<synchronous>, transform_indices = @transform_4, window_bounds = array<i64: 32, 64>}, {pipeline_mode = #tpu.pipeline_mode<synchronous>, transform_indices = @transform_5, window_bounds = array<i64: 32, 64>}, {pipeline_mode = #tpu.pipeline_mode<synchronous>, transform_indices = @transform_6, window_bounds = array<i64: 1, 64>}, {transform_indices = @transform_7, window_bounds = array<i64: 16, 32>}]} {
    %c0 = arith.constant 0 : index
    %c0_0 = arith.constant 0 : index
    %0 = vector.load %arg1[%c0, %c0_0] : memref<16x32xf32, #tpu.memory_space<vmem>>, vector<16x32xf32>
    %c0_1 = arith.constant 0 : index
    %c0_2 = arith.constant 0 : index
    %1 = vector.load %arg4[%c0_1, %c0_2] : memref<32x64xf32, #tpu.memory_space<vmem>>, vector<32x64xf32>
    %cst = arith.constant dense<0.000000e+00> : vector<16x64xf32>
    %2 = tpu.matmul %0, %1, %cst {dimension_numbers = #tpu.dot_dimension_numbers<[1], [0], [0], [1], [0, 0, 1, 1], [], []>} : vector<16x32xf32>, vector<32x64xf32>, vector<16x64xf32> -> vector<16x64xf32>
    %c0_3 = arith.constant 0 : index
    %c0_4 = arith.constant 0 : index
    %3 = vector.load %arg2[%c0_3, %c0_4] : memref<16x32xf32, #tpu.memory_space<vmem>>, vector<16x32xf32>
    %c0_5 = arith.constant 0 : index
    %c0_6 = arith.constant 0 : index
    %4 = vector.load %arg5[%c0_5, %c0_6] : memref<32x64xf32, #tpu.memory_space<vmem>>, vector<32x64xf32>
    %cst_7 = arith.constant dense<0.000000e+00> : vector<16x64xf32>
    %5 = tpu.matmul %3, %4, %cst_7 {dimension_numbers = #tpu.dot_dimension_numbers<[1], [0], [0], [1], [0, 0, 1, 1], [], []>} : vector<16x32xf32>, vector<32x64xf32>, vector<16x64xf32> -> vector<16x64xf32>
    %6 = arith.addf %2, %5 : vector<16x64xf32>
    %c0_8 = arith.constant 0 : index
    %c0_9 = arith.constant 0 : index
    %7 = vector.load %arg3[%c0_8, %c0_9] : memref<16x32xf32, #tpu.memory_space<vmem>>, vector<16x32xf32>
    %c0_10 = arith.constant 0 : index
    %c0_11 = arith.constant 0 : index
    %8 = vector.load %arg6[%c0_10, %c0_11] : memref<32x64xf32, #tpu.memory_space<vmem>>, vector<32x64xf32>
    %cst_12 = arith.constant dense<0.000000e+00> : vector<16x64xf32>
    %9 = tpu.matmul %7, %8, %cst_12 {dimension_numbers = #tpu.dot_dimension_numbers<[1], [0], [0], [1], [0, 0, 1, 1], [], []>} : vector<16x32xf32>, vector<32x64xf32>, vector<16x64xf32> -> vector<16x64xf32>
    %10 = arith.addf %6, %9 : vector<16x64xf32>
    %c0_13 = arith.constant 0 : index
    %c0_14 = arith.constant 0 : index
    %11 = vector.load %arg7[%c0_13, %c0_14] : memref<1x64xf32, #tpu.memory_space<vmem>>, vector<1x64xf32>
    %12 = vector.broadcast %11 : vector<1x64xf32> to vector<16x64xf32>
    %13 = arith.addf %10, %12 : vector<16x64xf32>
    %14 = vector.extract_strided_slice %13 {offsets = [0, 0], sizes = [16, 32], strides = [1, 1]} : vector<16x64xf32> to vector<16x32xf32>
    %15 = math.tanh %14 : vector<16x32xf32>
    %16 = vector.extract_strided_slice %13 {offsets = [0, 32], sizes = [16, 32], strides = [1, 1]} : vector<16x64xf32> to vector<16x32xf32>
    %17 = arith.negf %16 : vector<16x32xf32>
    %18 = math.exp %17 : vector<16x32xf32>
    %cst_15 = arith.constant 1.000000e+00 : f32
    %19 = vector.broadcast %cst_15 : f32 to vector<16x32xf32>
    %20 = arith.addf %19, %18 : vector<16x32xf32>
    %21 = arith.divf %19, %20 : vector<16x32xf32>
    %22 = arith.mulf %15, %21 : vector<16x32xf32>
    %c0_16 = arith.constant 0 : index
    %c0_17 = arith.constant 0 : index
    %23 = vector.load %arg8[%c0_16, %c0_17] : memref<16x32xf32, #tpu.memory_space<vmem>>, vector<16x32xf32>
    tpu.vector_store %arg8[%c0_16, %c0_17], %22 {strides = array<i32>} : memref<16x32xf32, #tpu.memory_space<vmem>>, vector<16x32xf32>,
    return
  }
  func.func @transform_0(%arg0: i32) -> (i32, i32) {
    %c0_i32 = arith.constant 0 : i32
    %c0_i32_0 = arith.constant 0 : i32
    return %arg0, %c0_i32 : i32, i32
  }
  func.func @transform_1(%arg0: i32) -> (i32, i32) {
    %c0_i32 = arith.constant 0 : i32
    %c0_i32_0 = arith.constant 0 : i32
    return %arg0, %c0_i32 : i32, i32
  }
  func.func @transform_2(%arg0: i32) -> (i32, i32) {
    %c0_i32 = arith.constant 0 : i32
    %c0_i32_0 = arith.constant 0 : i32
    return %arg0, %c0_i32 : i32, i32
  }
  func.func @transform_3(%arg0: i32) -> (i32, i32) {
    %c0_i32 = arith.constant 0 : i32
    %c0_i32_0 = arith.constant 0 : i32
    %c0_i32_1 = arith.constant 0 : i32
    return %c0_i32, %c0_i32_0 : i32, i32
  }
  func.func @transform_4(%arg0: i32) -> (i32, i32) {
    %c0_i32 = arith.constant 0 : i32
    %c0_i32_0 = arith.constant 0 : i32
    %c0_i32_1 = arith.constant 0 : i32
    return %c0_i32, %c0_i32_0 : i32, i32
  }
  func.func @transform_5(%arg0: i32) -> (i32, i32) {
    %c0_i32 = arith.constant 0 : i32
    %c0_i32_0 = arith.constant 0 : i32
    %c0_i32_1 = arith.constant 0 : i32
    return %c0_i32, %c0_i32_0 : i32, i32
  }
  func.func @transform_6(%arg0: i32) -> (i32, i32) {
    %c0_i32 = arith.constant 0 : i32
    %c0_i32_0 = arith.constant 0 : i32
    %c0_i32_1 = arith.constant 0 : i32
    return %c0_i32, %c0_i32_0 : i32, i32
  }
  func.func @transform_7(%arg0: i32) -> (i32, i32) {
    %c0_i32 = arith.constant 0 : i32
    %c0_i32_0 = arith.constant 0 : i32
    return %arg0, %c0_i32 : i32, i32
  }
}

</mosaic_0001>

<bundles_post_ra>
// kernel: subtree_merger_forward.1
= control target key start
LH: loop header
LB: loop body
LE: loop exit
PB: predicated region body
PF: predicated region fallthrough
CT: control target
= control target key end

     0   :  { %12 = vsyncpa [#allocation3], 0  ;;  %s763_s0 = inlined_call_operand.hbm [shape: f32[16,32], index: 0, kind: input, shape index: {}]   ;;  %s764_s1 = inlined_call_operand.hbm [shape: f32[16,32], index: 1, kind: input, shape index: {}]   ;;  %s765_s2 = inlined_call_operand.hbm [shape: f32[16,32], index: 2, kind: input, shape index: {}]   ;;  %s766_s3 = inlined_call_operand.hbm [shape: f32[32,64], index: 3, kind: input, shape index: {}]   ;;  %s767_s4 = inlined_call_operand.hbm [shape: f32[32,64], index: 4, kind: input, shape index: {}]   ;;  %s768_s5 = inlined_call_operand.hbm [shape: f32[32,64], index: 5, kind: input, shape index: {}]   ;;  %s769_s6 = inlined_call_operand.vmem [shape: f32[1,64], index: 6, kind: input, shape index: {}]   ;;  %s770_s7 = inlined_call_operand.hbm [shape: f32[16,32], index: 7, kind: output, shape index: {}]  }
   0x1   :  { %13 = vsyncpa [#allocation6], 0 }
   0x2   :  { %14 = vsyncpa [#allocation9], 0 }
   0x3   :  { %15 = vsyncpa [#allocation12], 0 }
   0x4   :  { %16 = vsyncpa [#allocation4], 0  ;;  %s660_s24 = smov [#allocation5]   ;;  %s661_s26 = smov [#allocation8]  }
   0x5   :  { %s34_s25 = sshll.u32 %s660_s24, 4  ;;  %s58_s27 = sshll.u32 %s661_s26, 4  ;;  %s35_s25 = int_to_ptr.vmem [resolvable:$true] %s34_s25  ;;  %s59_s27 = int_to_ptr.vmem [resolvable:$true] %s58_s27 }
   0x6   :  { %s518_s28 = scalar_lea.vmem %s35_s25, 256  ;;  %p523_p1 = scmp.lt.s32.totalorder %s35_s25, %s35_s25 }
   0x7   :  { %p519_p0 = scmp.ne.s32.totalorder %s35_s25, %s518_s28  ;;  %p524_p2 = scmp.lt.s32.totalorder %s518_s28, %s518_s28 }
   0x9   :  { %p525_p3 = por %p524_p2, %p523_p1 }
   0xb   :  { %p526_p4 = pnand %p525_p3, %p519_p0 }
   0xd   :  { %529 = shalt.err (!%p526_p4)
}
   0xe   :  { %s662_s29 = smov 128   ;;  %s663_s30 = smov 8  }
   0xf   :  { %40 = dma.hbm_to_vmem [thread:$0]  %s764_s1, 256, %s35_s25, [#allocation6], %s662_s29, %s662_s29, %s663_s30  }
  0x10   :  { %s538_s10 = scalar_lea.vmem %s59_s27, 512  ;;  %p543_p6 = scmp.lt.s32.totalorder %s59_s27, %s59_s27 }
  0x11   :  { %p539_p5 = scmp.ne.s32.totalorder %s59_s27, %s538_s10  ;;  %p544_p7 = scmp.lt.s32.totalorder %s538_s10, %s538_s10 }
  0x13   :  { %p545_p8 = por %p544_p7, %p543_p6 }
  0x15   :  { %p546_p9 = pnand %p545_p8, %p539_p5 }
  0x17   :  { %549 = shalt.err (!%p546_p9)
}
  0x18   :  { %64 = dma.hbm_to_vmem [thread:$0]  %s766_s3, 512, %s59_s27, [#allocation9], %s662_s29, %s662_s29, %s663_s30  }
  0x19   :  { %s664_s13 = smov [#allocation2]   ;;  %s665_s15 = smov [#allocation7]  }
  0x1a   :  { %s22_s14 = sshll.u32 %s664_s13, 4  ;;  %s46_s16 = sshll.u32 %s665_s15, 4  ;;  %s23_s14 = int_to_ptr.vmem [resolvable:$true] %s22_s14  ;;  %s47_s16 = int_to_ptr.vmem [resolvable:$true] %s46_s16 }
  0x1b   :  { %s558_s1 = scalar_lea.vmem %s23_s14, 256  ;;  %p563_p11 = scmp.lt.s32.totalorder %s23_s14, %s23_s14 }
  0x1c   :  { %p559_p10 = scmp.ne.s32.totalorder %s23_s14, %s558_s1  ;;  %p564_p12 = scmp.lt.s32.totalorder %s558_s1, %s558_s1 }
  0x1e   :  { %p565_p13 = por %p564_p12, %p563_p11 }
  0x20   :  { %p566_p0 = pnand %p565_p13, %p559_p10 }
  0x22   :  { %569 = shalt.err (!%p566_p0)
}
  0x23   :  { %28 = dma.hbm_to_vmem [thread:$0]  %s763_s0, 256, %s23_s14, [#allocation3], %s662_s29, %s662_s29, %s663_s30  }
  0x24   :  { %s578_s3 = scalar_lea.vmem %s47_s16, 256  ;;  %p583_p2 = scmp.lt.s32.totalorder %s47_s16, %s47_s16 }
  0x25   :  { %p579_p1 = scmp.ne.s32.totalorder %s47_s16, %s578_s3  ;;  %p584_p3 = scmp.lt.s32.totalorder %s578_s3, %s578_s3 }
  0x27   :  { %p585_p4 = por %p584_p3, %p583_p2 }
  0x29   :  { %p586_p5 = pnand %p585_p4, %p579_p1 }
  0x2b   :  { %589 = shalt.err (!%p586_p5)
}
  0x2c   :  { %52 = dma.hbm_to_vmem [thread:$0]  %s765_s2, 256, %s47_s16, [#allocation6], %s662_s29, %s662_s29, %s663_s30  }
  0x2d   :  { %s666_s21 = smov [#allocation10]   ;;  %s667_s23 = smov [#allocation11]  }
  0x2e   :  { %s70_s22 = sshll.u32 %s666_s21, 4  ;;  %s82_s24 = sshll.u32 %s667_s23, 4  ;;  %s71_s22 = int_to_ptr.vmem [resolvable:$true] %s70_s22  ;;  %s83_s24 = int_to_ptr.vmem [resolvable:$true] %s82_s24 }
  0x2f   :  { %s598_s0 = scalar_lea.vmem %s71_s22, 512  ;;  %p603_p7 = scmp.lt.s32.totalorder %s71_s22, %s71_s22 }
  0x30   :  { %p599_p6 = scmp.ne.s32.totalorder %s71_s22, %s598_s0  ;;  %p604_p8 = scmp.lt.s32.totalorder %s598_s0, %s598_s0 }
  0x32   :  { %p605_p9 = por %p604_p8, %p603_p7 }
  0x34   :  { %p606_p10 = pnand %p605_p9, %p599_p6 }
  0x36   :  { %609 = shalt.err (!%p606_p10)
}
  0x37   :  { %76 = dma.hbm_to_vmem [thread:$0]  %s767_s4, 512, %s71_s22, [#allocation9], %s662_s29, %s662_s29, %s663_s30  }
  0x38   :  { %s618_s2 = scalar_lea.vmem %s83_s24, 512  ;;  %p623_p12 = scmp.lt.s32.totalorder %s83_s24, %s83_s24 }
  0x39   :  { %p619_p11 = scmp.ne.s32.totalorder %s83_s24, %s618_s2  ;;  %p624_p13 = scmp.lt.s32.totalorder %s618_s2, %s618_s2 }
  0x3b   :  { %p625_p0 = por %p624_p13, %p623_p12 }
  0x3d   :  { %p626_p1 = pnand %p625_p0, %p619_p11 }
  0x3f   :  { %629 = shalt.err (!%p626_p1)
}
  0x40   :  { %88 = dma.hbm_to_vmem [thread:$0]  %s768_s5, 512, %s83_s24, [#allocation12], %s662_s29, %s662_s29, %s663_s30  }
  0x41   :  { %650 = dma.done.wait [#allocation3], 256  }
  0x42   :  { %651 = vsyncadd [#allocation3], 4294967040 }
  0x43   :  { %652 = dma.done.wait [#allocation6], 512  }
  0x44   :  { %653 = vsyncadd [#allocation6], 4294966784 }
  0x45   :  { %654 = dma.done.wait [#allocation9], 1024  }
  0x46   :  { %655 = vsyncadd [#allocation9], 4294966272 }
  0x47   :  { %656 = dma.done.wait [#allocation12], 512  }
  0x48   :  { %657 = vsyncadd [#allocation12], 4294966784  ;;  %v120_v0 = vld [vmem:[#allocation10 + $0x18] sm:$0xff]  ;;  %v119_v2 = vld [vmem:[#allocation10 + $0x10] sm:$0xff]  ;;  %vm121_vm0 = vcmask 261120   ;;  %s668_s8 = smov 96  }
  0x49   :  { %v114_v1 = vld [vmem:[#allocation8 + $0x18] sm:$0xff]  ;;  %455 = vmatprep.subr.mxu0 %v120_v0  ;;  %v113_v3 = vld [vmem:[#allocation8 + $0x10] sm:$0xff]  ;;  %v118_v4 = vld [vmem:[#allocation10 + $0x8] sm:$0xff] }
  0x4a   :  { %466 = vmatprep.subr.mxu1 %v114_v1  ;;  %456 = vmatpush3.msra.mxu0 %v120_v0  ;;  %v112_v5 = vld [vmem:[#allocation8 + $0x8] sm:$0xff]  ;;  %v117_v6 = vld [vmem:[#allocation10] sm:$0xff]  ;;  %v109_v9 = vld [vmem:[#allocation2] sm:$0xff] }
  0x4b   :  { %467 = vmatpush3.msra.mxu1 %v114_v1  ;;  %457 = vmatprep.subr.mxu0 %v119_v2  ;;  %v111_v7 = vld [vmem:[#allocation8] sm:$0xff]  ;;  %v116_v10 = vld [vmem:[#allocation5 + $0x8] sm:$0xff]  ;;  %v110_v11 = vld [vmem:[#allocation2 + $0x8] sm:$0xff] }
  0x4c   :  { %468 = vmatprep.subr.mxu1 %v113_v3  ;;  %458 = vmatpush3.msra.mxu0 %v119_v2  ;;  %v115_v8 = vld [vmem:[#allocation5] sm:$0xff]  ;;  %v289_v12 = vld [vmem:[#allocation11 + $0x18] sm:$0xff]  ;;  %v284_v13 = vld [vmem:[#allocation7] sm:$0xff] }
  0x4d   :  { %469 = vmatpush3.msra.mxu1 %v113_v3  ;;  %459 = vmatprep.subr.mxu0 %v118_v4  ;;  %v288_v14 = vld [vmem:[#allocation11 + $0x10] sm:$0xff]  ;;  %v287_v15 = vld [vmem:[#allocation11 + $0x8] sm:$0xff]  ;;  %v286_v16 = vld [vmem:[#allocation11] sm:$0xff] }
  0x4e   :  { %470 = vmatprep.subr.mxu1 %v112_v5  ;;  %460 = vmatpush3.msra.mxu0 %v118_v4  ;;  %v285_v17 = vld [vmem:[#allocation7 + $0x8] sm:$0xff]  ;;  %v434_v24 = vld [vmem:[%s769_s6] ss:$0 sm:$0xff]  ;;  %s669_s6 = smov [#allocation13]  }
  0x4f   :  { %471 = vmatpush3.msra.mxu1 %v112_v5  ;;  %461 = vmatprep.subr.mxu0 %v117_v6  ;;  %s413_s9 = sshll.u32 %s669_s6, 4  ;;  %s414_s9 = int_to_ptr.vmem [resolvable:$true] %s413_s9 }
  0x50   :  { %472 = vmatprep.subr.mxu1 %v111_v7  ;;  %462 = vmatpush3.msra.mxu0 %v117_v6  ;;  %s630_s10 = scalar_lea.vmem %s414_s9, 256  ;;  %p635_p3 = scmp.lt.s32.totalorder %s414_s9, %s414_s9 }
  0x51   :  { %463 = vmatprep.mubr.msk.f32.mxu0 %vm121_vm0, %v115_v8  ;;  %473 = vmatpush3.msra.mxu1 %v111_v7  ;;  %p631_p2 = scmp.ne.s32.totalorder %s414_s9, %s630_s10  ;;  %p636_p4 = scmp.lt.s32.totalorder %s630_s10, %s630_s10 }
  0x52   :  { %474 = vmatprep.mubr.msk.f32.mxu1 %vm121_vm0, %v109_v9  ;;  %464 = vmatmul.mubr.msk.f32.vlgmr.msra.gmra.mxu0 %vm121_vm0, %v116_v10 }
  0x53   :  { %475 = vmatmul.mubr.msk.f32.vlgmr.msra.gmra.mxu1 %vm121_vm0, %v110_v11  ;;  %477 = vmatprep.subr.mxu0 %v289_v12  ;;  %p637_p5 = por %p636_p4, %p635_p3 }
  0x54   :  { %485 = vmatprep.mubr.msk.f32.mxu0 %vm121_vm0, %v284_v13  ;;  %478 = vmatpush3.msra.mxu0 %v289_v12 }
  0x55   :  { %479 = vmatprep.subr.mxu0 %v288_v14  ;;  %p638_p6 = pnand %p637_p5, %p631_p2 }
  0x56   :  { %480 = vmatpush3.msra.mxu0 %v288_v14 }
  0x57   :  { %481 = vmatprep.subr.mxu0 %v287_v15 }
  0x58   :  { %482 = vmatpush3.msra.mxu0 %v287_v15 }
  0x59   :  { %483 = vmatprep.subr.mxu0 %v286_v16 }
  0x5a   :  { %484 = vmatpush3.msra.mxu0 %v286_v16 }
  0x5b   :  { %486 = vmatmul.mubr.msk.f32.vlgmr.msra.gmra.mxu0 %vm121_vm0, %v285_v17 }
 0x112   :  { %v465_v18 = vpop.f32.mrf.mxu0 }
 0x113   :  { %v476_v19 = vpop.f32.mrf.mxu1 }
 0x114   :  { %v194_v20 = vpop.f32.mrf.mxu0  ;;  %v281_v22 = vadd.f32 %v476_v19, %v465_v18 }
 0x115   :  { %v275_v21 = vpop.f32.mrf.mxu1 }
 0x116   :  { %v276_v25 = vadd.f32 %v275_v21, %v194_v20 }
 0x11b   :  { %v487_v23 = vpop.f32.mrf.mxu0 }
 0x11c   :  { %v372_v26 = vadd.f32 %v487_v23, %v281_v22 }
 0x11d   :  { %v362_v27 = vpop.f32.mrf.mxu0 }
 0x11e   :  { %v381_v28 = vadd.f32 %v434_v24, %v372_v26  ;;  %v371_v29 = vadd.f32 %v362_v27, %v276_v25 }
 0x120   :  { %v436_v30 = vmul.f32 -1.442695, %v381_v28  ;;  %v380_v31 = vadd.f32 %v434_v24, %v371_v29 }
 0x122   :  { %v435_v32 = vmul.f32 -1.442695, %v380_v31  ;;  %498 = vpow2.f32 %v436_v30 }
 0x124   :  { %500 = vpow2.f32 %v435_v32 }
 0x12f   :  { %v499_v33 = vpop.eup %498 }
 0x130   :  { %v391_v36 = vadd.f32 1.0, %v499_v33 }
 0x131   :  { %v501_v34 = vpop.eup %500 }
 0x132   :  { %v390_v35 = vadd.f32 1.0, %v501_v34 }
 0x134   :  { %502 = vrcp.f32 %v390_v35 }
 0x135   :  { %504 = vrcp.f32 %v391_v36 }
 0x136   :  { %506 = vtanh.f32 %v380_v31 }
 0x137   :  { %508 = vtanh.f32 %v381_v28 }
 0x141   :  { %v503_v37 = vpop.eup %502 }
 0x142   :  { %398 = vrot.lane.b32.xlu0 %v503_v37, %s668_s8  ;;  %v505_v38 = vpop.eup %504 }
 0x143   :  { %v507_v39 = vpop.eup %506 }
 0x144   :  { %v509_v42 = vpop.eup %508 }
 0x146   :  { %400 = vrot.lane.b32.xlu0 %v505_v38, %s668_s8 }
 0x1b4   :  { %v399_v40 = vpop.permute.xlu0 %398 }
 0x1b5   :  { %v404_v41 = vmul.f32 %v507_v39, %v399_v40 }
 0x1b7   :  { %406 = vst.msk [vmem:[#allocation13] sm:$0xff] %vm121_vm0, %v404_v41 }
 0x1b8   :  { %v401_v43 = vpop.permute.xlu0 %400 }
 0x1b9   :  { %v405_v44 = vmul.f32 %v509_v42, %v401_v43 }
 0x1bb   :  { %407 = vst.msk [vmem:[#allocation13 + $0x8] sm:$0xff] %vm121_vm0, %v405_v44 }
 0x1bc   :  { %641 = shalt.err (!%p638_p6)
}
 0x1bd   :  { %419 = dma.vmem_to_hbm [thread:$0]  %s414_s9, 256, %s770_s7, [#allocation4], %s662_s29, %s662_s29, %s663_s30  }
 0x1be   :  { %658 = dma.done.wait [#allocation4], 256  }
 0x1bf   :  { %659 = vsyncadd [#allocation4], 4294967040 }
 0x1c0   :  { %423 = vsyncpa [#allocation3], 1 }
 0x1c1   :  { %424 = vsyncpa [#allocation6], 1 }
 0x1c2   :  { %425 = vsyncpa [#allocation9], 1 }
 0x1c3   :  { %426 = vsyncpa [#allocation12], 1 }
 0x1c4   :  { %427 = vsyncpa [#allocation4], 1 }

</bundles_post_ra>
